<compile_context>
chip_gen: v7x
topology: tpu7x:2x2x1
jax: 0.10.0
libtpu: 0.0.40
codegen_flags: <defaults>
</compile_context>

<pallas_src>
import functools

import jax
import jax.numpy as jnp
from jax.experimental import pallas as pl
from jax.experimental.pallas import tpu as pltpu


# -----------------------------------------------------------------------------
# Fused multi-layer LSTM rollout kernel: grid=(T,), state resident in VMEM.
# -----------------------------------------------------------------------------
def _lstm_rollout_kernel(feat_ref, state_in_ref, w_ref,      # inputs
                         hseq_ref, state_ref,                # outputs
                         xh_ref,                             # VMEM scratch [B, K_pad]
                         *, num_layers, hidden_size, in_size, kx):
    H = hidden_size
    C = in_size
    B = feat_ref.shape[1]
    bias_lane = kx + H
    t = pl.program_id(0)

    # ---- once per rollout: zero the xh slab (pad + bias lanes) and load the
    #      initial LSTM state into the resident (aliased) output buffer.
    @pl.when(t == 0)
    def _init():
        xh_ref[...] = jnp.zeros_like(xh_ref)
        xh_ref[:, bias_lane:bias_lane + 1] = jnp.ones((B, 1), jnp.float32)
        state_ref[...] = state_in_ref[...]

    mm_dtype = w_ref.dtype                   # bf16 weights -> bf16 MXU, f32 accum

    # ---- this step's pre-concatenated features -> x lanes of the slab.
    xh_ref[:, 0:C] = feat_ref[0].astype(jnp.float32)
    if C < kx:                               # static guard; no-op in shipped config
        xh_ref[:, C:kx] = jnp.zeros((B, kx - C), jnp.float32)

    # ---- static unroll over layers (strict sequential dependency, L is small).
    for layer in range(num_layers):
        lo, hi = layer * H, (layer + 1) * H
        h_prev = state_ref[0, :, lo:hi]      # [B, H] f32
        c_prev = state_ref[1, :, lo:hi]      # [B, H] f32

        xh_ref[:, kx:kx + H] = h_prev
        # gates = [x | h | 1 | 0-pad] @ [[W_ih^T],[W_hh^T],[b],[0]]  -> [B, 4H]
        gates = jnp.dot(xh_ref[...].astype(mm_dtype), w_ref[layer],
                        preferred_element_type=jnp.float32)

        # Full-width activations (2 EUP issues per layer instead of 4), then slice.
        sig = jax.nn.sigmoid(gates)
        tnh = jnp.tanh(gates)
        i_g = sig[:, 0 * H:1 * H]
        f_g = sig[:, 1 * H:2 * H]
        g_g = tnh[:, 2 * H:3 * H]
        o_g = sig[:, 3 * H:4 * H]

        c_new = f_g * c_prev + i_g * g_g
        h_new = o_g * jnp.tanh(c_new)

        state_ref[0, :, lo:hi] = h_new
        state_ref[1, :, lo:hi] = c_new

        if layer + 1 < num_layers:
            xh_ref[:, 0:H] = h_new           # next layer's input x
            if H < kx:                       # static guard; no-op in shipped config
                xh_ref[:, H:kx] = jnp.zeros((B, kx - H), jnp.float32)
        else:
            hseq_ref[0] = h_new              # per-step last-layer hidden state

    # TODO(synk): training-mode dropout not emitted (inference = identity).


# -----------------------------------------------------------------------------
# Rollout wrapper: T timesteps, ONE pallas_call.
# -----------------------------------------------------------------------------
def core_rollout(params, feat_seq, packed_state):
    """Run T LSTM timesteps in a single fused kernel.

    feat_seq:     [T, B, core_input_size] float32 (pre-concatenated features)
    packed_state: [2, B, L*H] float32 (index 0 = h, 1 = c; layers along lanes)
    returns: (h_seq [T, B, H] f32, new_packed_state [2, B, L*H] f32)
    """
    L, H = params["num_layers"], params["hidden_size"]
    C, kx, k_pad = params["core_input_size"], params["kx"], params["k_pad"]
    T, B, cin = feat_seq.shape
    assert cin == C

    kernel = functools.partial(_lstm_rollout_kernel, num_layers=L,
                               hidden_size=H, in_size=C, kx=kx)

    return pl.pallas_call(
        kernel,
        grid=(T,),
        out_shape=(jax.ShapeDtypeStruct((T, B, H), jnp.float32),
                   jax.ShapeDtypeStruct((2, B, L * H), jnp.float32)),
        in_specs=[
            pl.BlockSpec((1, B, C), lambda t: (t, 0, 0)),           # per-step features
            pl.BlockSpec((2, B, L * H), lambda t: (0, 0, 0)),       # init state (DMA once)
            pl.BlockSpec((L, k_pad, 4 * H), lambda t: (0, 0, 0)),   # weights (DMA once)
        ],
        out_specs=(
            pl.BlockSpec((1, B, H), lambda t: (t, 0, 0)),           # per-step h
            pl.BlockSpec((2, B, L * H), lambda t: (0, 0, 0)),       # final state (once)
        ),
        scratch_shapes=[pltpu.VMEM((B, k_pad), jnp.float32)],       # persistent xh slab
        input_output_aliases={1: 1},        # new state overwrites old state buffer (P8)
        compiler_params=pltpu.CompilerParams(
            dimension_semantics=("arbitrary",)),                    # state carried over t
    )(feat_seq.astype(jnp.float32), packed_state, params["w"])


# -----------------------------------------------------------------------------
# Parameter construction (PyTorch-style uniform(-1/sqrt(H), 1/sqrt(H))),
# pre-packed for the fused kernel: W[l] = [[W_ih^T],[W_hh^T],[b_ih+b_hh],[0-pad]]
# of shape [K_pad, 4H] (gate order [i, f, g, o] preserved), K_pad lane-dense 128.
# -----------------------------------------------------------------------------
def init_core_params(key, core_input_size, hidden_size, num_layers,
                     matmul_dtype=jnp.bfloat16):
    H, C = hidden_size, core_input_size
    kx = max(C, H)                              # lane width reserved for the input x
    k_pad = -(-(kx + H + 1) // 128) * 128       # pad K (incl. bias lane) to 128 lanes
    bound = 1.0 / (float(H) ** 0.5)

    ws = []
    for layer in range(num_layers):
        in_sz = C if layer == 0 else H
        key, k1, k2, k3, k4 = jax.random.split(key, 5)
        w_ih = jax.random.uniform(k1, (4 * H, in_sz), minval=-bound, maxval=bound,
                                  dtype=jnp.float32)
        w_hh = jax.random.uniform(k2, (4 * H, H), minval=-bound, maxval=bound,
                                  dtype=jnp.float32)
        b_ih = jax.random.uniform(k3, (4 * H,), minval=-bound, maxval=bound,
                                  dtype=jnp.float32)
        b_hh = jax.random.uniform(k4, (4 * H,), minval=-bound, maxval=bound,
                                  dtype=jnp.float32)
        w = jnp.zeros((k_pad, 4 * H), jnp.float32)
        w = w.at[0:in_sz, :].set(w_ih.T)        # rows for x
        w = w.at[kx:kx + H, :].set(w_hh.T)      # rows for h
        w = w.at[kx + H, :].set(b_ih + b_hh)    # bias row (hit by the ones lane)
        ws.append(w)

    return {
        "w": jnp.stack(ws, axis=0).astype(matmul_dtype),   # [L, k_pad, 4H]
        "num_layers": num_layers,
        "hidden_size": H,
        "core_input_size": C,
        "kx": kx,
        "k_pad": k_pad,
    }


# -----------------------------------------------------------------------------
# State packing helpers (HBM-facing state is [2, B, L*H]; API is ([L,B,H],[L,B,H]))
# -----------------------------------------------------------------------------
def pack_state(h, c):
    L, B, H = h.shape
    hp = jnp.transpose(h.astype(jnp.float32), (1, 0, 2)).reshape(B, L * H)
    cp = jnp.transpose(c.astype(jnp.float32), (1, 0, 2)).reshape(B, L * H)
    return jnp.stack([hp, cp], axis=0)


def unpack_state(packed, num_layers, hidden_size):
    _, B, _ = packed.shape
    L, H = num_layers, hidden_size
    h = jnp.transpose(packed[0].reshape(B, L, H), (1, 0, 2))
    c = jnp.transpose(packed[1].reshape(B, L, H), (1, 0, 2))
    return h, c


# -----------------------------------------------------------------------------
# Core.forward equivalent (PyTorch-compatible signature / returns, seq_len = 1)
# -----------------------------------------------------------------------------
def core_forward(params, own_embedded_unit, enemy_embedded_unit,
                 embedded_spatial, scalar_features, lstm_state=None):
    """
    returns: core_output [B, 1, H],  (h_n [L, B, H], c_n [L, B, H])
    """
    L, H = params["num_layers"], params["hidden_size"]
    B = own_embedded_unit.shape[0]

    feat = jnp.concatenate(
        [own_embedded_unit.reshape(B, -1), enemy_embedded_unit.reshape(B, -1),
         embedded_spatial.reshape(B, -1), scalar_features.reshape(B, -1)],
        axis=-1).astype(jnp.float32)

    if lstm_state is None:
        packed = jnp.zeros((2, B, L * H), jnp.float32)
    else:
        packed = pack_state(*lstm_state)

    h_seq, new_packed = core_rollout(params, feat[None], packed)
    h_n, c_n = unpack_state(new_packed, L, H)
    core_output = h_seq[0][:, None, :]          # [B, 1, H]
    # dropout: inference mode -> identity
    return core_output, (h_n, c_n)


# -----------------------------------------------------------------------------
# Pure-JAX reference (same packed bf16 weights, same slab/bias-lane math)
# -----------------------------------------------------------------------------
def core_rollout_reference(params, feat_seq, h0, c0):
    L, H = params["num_layers"], params["hidden_size"]
    C, kx, k_pad = params["core_input_size"], params["kx"], params["k_pad"]
    T, B, _ = feat_seq.shape
    w = params["w"].astype(jnp.float32)
    mm = params["w"].dtype

    h = [h0[l] for l in range(L)]
    c = [c0[l] for l in range(L)]
    outs = []
    for t in range(T):
        slab = jnp.zeros((B, k_pad), jnp.float32)
        slab = slab.at[:, 0:C].set(feat_seq[t].astype(jnp.float32))
        slab = slab.at[:, kx + H].set(1.0)
        for layer in range(L):
            xh = slab.at[:, kx:kx + H].set(h[layer])
            xh = xh.astype(mm).astype(jnp.float32)   # mimic bf16 MXU operand rounding
            gates = jnp.dot(xh, w[layer], precision=jax.lax.Precision.HIGHEST)
            i_g = jax.nn.sigmoid(gates[:, 0:H])
            f_g = jax.nn.sigmoid(gates[:, H:2 * H])
            g_g = jnp.tanh(gates[:, 2 * H:3 * H])
            o_g = jax.nn.sigmoid(gates[:, 3 * H:4 * H])
            c_new = f_g * c[layer] + i_g * g_g
            h_new = o_g * jnp.tanh(c_new)
            h[layer], c[layer] = h_new, c_new
            slab = slab.at[:, 0:kx].set(0.0).at[:, 0:H].set(h_new)
        outs.append(h[L - 1])
    return jnp.stack(outs), (jnp.stack(h), jnp.stack(c))


def core_forward_reference(params, own, enemy, spatial, scalar, lstm_state=None):
    L, H = params["num_layers"], params["hidden_size"]
    B = own.shape[0]
    feat = jnp.concatenate([own.reshape(B, -1), enemy.reshape(B, -1),
                            spatial.reshape(B, -1), scalar.reshape(B, -1)],
                           axis=-1).astype(jnp.float32)
    if lstm_state is None:
        h0 = jnp.zeros((L, B, H), jnp.float32)
        c0 = jnp.zeros((L, B, H), jnp.float32)
    else:
        h0, c0 = lstm_state
    h_seq, (h_n, c_n) = core_rollout_reference(params, feat[None], h0, c0)
    return h_seq[0][:, None, :], (h_n, c_n)


# -----------------------------------------------------------------------------
if __name__ == "__main__":
    UNIT_EMBEDDING_SIZE = 8
    SPATIAL_EMBEDDING_SIZE = 8
    SCALAR_FEATURE_SIZE = 8
    CORE_OUTPUT_SIZE = 32          # hidden_size
    CORE_LAYERS = 2
    BATCH = 2
    ROLLOUT_T = 8
    CORE_INPUT_SIZE = (UNIT_EMBEDDING_SIZE * 2 + SPATIAL_EMBEDDING_SIZE
                       + SCALAR_FEATURE_SIZE)  # 32

    key = jax.random.PRNGKey(0)
    kp, k1, k2, k3, k4, k5 = jax.random.split(key, 6)

    params = init_core_params(kp, CORE_INPUT_SIZE, CORE_OUTPUT_SIZE, CORE_LAYERS)

    own_embedded_unit = jax.random.normal(k1, (BATCH, UNIT_EMBEDDING_SIZE), jnp.float32)
    enemy_embedded_unit = jax.random.normal(k2, (BATCH, UNIT_EMBEDDING_SIZE), jnp.float32)
    embedded_spatial = jax.random.normal(k3, (BATCH, SPATIAL_EMBEDDING_SIZE), jnp.float32)
    scalar_features = jax.random.normal(k4, (BATCH, SCALAR_FEATURE_SIZE), jnp.float32)

    TOL = 2e-2

    # ---- PyTorch-equivalent single-step API (T = 1), with state feedback ----
    out1, state1 = core_forward(params, own_embedded_unit, enemy_embedded_unit,
                                embedded_spatial, scalar_features, lstm_state=None)
    out2, state2 = core_forward(params, own_embedded_unit, enemy_embedded_unit,
                                embedded_spatial, scalar_features, lstm_state=state1)
    jax.block_until_ready((out1, out2, state2))

    assert out1.shape == (BATCH, 1, CORE_OUTPUT_SIZE)
    assert out2.shape == (BATCH, 1, CORE_OUTPUT_SIZE)
    assert state2[0].shape == (CORE_LAYERS, BATCH, CORE_OUTPUT_SIZE)
    assert state2[1].shape == (CORE_LAYERS, BATCH, CORE_OUTPUT_SIZE)

    r_out1, r_state1 = core_forward_reference(params, own_embedded_unit,
                                              enemy_embedded_unit, embedded_spatial,
                                              scalar_features, None)
    r_out2, r_state2 = core_forward_reference(params, own_embedded_unit,
                                              enemy_embedded_unit, embedded_spatial,
                                              scalar_features, r_state1)
    assert float(jnp.max(jnp.abs(out1 - r_out1))) < TOL
    assert float(jnp.max(jnp.abs(out2 - r_out2))) < TOL
    assert float(jnp.max(jnp.abs(state2[0] - r_state2[0]))) < TOL
    assert float(jnp.max(jnp.abs(state2[1] - r_state2[1]))) < TOL

    # ---- multi-step rollout in a single pallas_call (the perf-critical path) ----
    feat_seq = jax.random.normal(k5, (ROLLOUT_T, BATCH, CORE_INPUT_SIZE), jnp.float32)
    packed0 = jnp.zeros((2, BATCH, CORE_LAYERS * CORE_OUTPUT_SIZE), jnp.float32)
    h_seq, packed_n = core_rollout(params, feat_seq, packed0)
    jax.block_until_ready((h_seq, packed_n))
    assert h_seq.shape == (ROLLOUT_T, BATCH, CORE_OUTPUT_SIZE)

    h0 = jnp.zeros((CORE_LAYERS, BATCH, CORE_OUTPUT_SIZE), jnp.float32)
    c0 = jnp.zeros_like(h0)
    r_h_seq, (r_hn, r_cn) = core_rollout_reference(params, feat_seq, h0, c0)
    hn, cn = unpack_state(packed_n, CORE_LAYERS, CORE_OUTPUT_SIZE)
    assert float(jnp.max(jnp.abs(h_seq - r_h_seq))) < TOL
    assert float(jnp.max(jnp.abs(hn - r_hn))) < TOL
    assert float(jnp.max(jnp.abs(cn - r_cn))) < TOL

    print("KERNEL_OK")
</pallas_src>

<mosaic_0001>
module attributes {stable_mosaic.version = 11 : i64} {
  func.func @_lstm_rollout_kernel(%arg0: i32, %arg1: memref<1x2x32xf32, #tpu.memory_space<vmem>>, %arg2: memref<2x2x64xf32, #tpu.memory_space<vmem>>, %arg3: memref<2x128x128xbf16, #tpu.memory_space<vmem>>, %arg4: memref<1x2x32xf32, #tpu.memory_space<vmem>>, %arg5: memref<2x2x64xf32, #tpu.memory_space<vmem>>, %arg6: memref<2x128xf32, #tpu.memory_space<vmem>>) attributes {dimension_semantics = [#tpu.dimension_semantics<arbitrary>], iteration_bounds = array<i64: 1>, scalar_prefetch = 0 : i64, scratch_operands = 1 : i64, tpu.core_type = #tpu.core_type<tc>, window_params = [{transform_indices = @transform_0, window_bounds = array<i64: 1, 2, 32>}, {pipeline_mode = #tpu.pipeline_mode<synchronous>, transform_indices = @transform_1, window_bounds = array<i64: 2, 2, 64>}, {pipeline_mode = #tpu.pipeline_mode<synchronous>, transform_indices = @transform_2, window_bounds = array<i64: 2, 128, 128>}, {transform_indices = @transform_3, window_bounds = array<i64: 1, 2, 32>}, {pipeline_mode = #tpu.pipeline_mode<synchronous>, transform_indices = @transform_4, window_bounds = array<i64: 2, 2, 64>}]} {
    %c0_i32 = arith.constant 0 : i32
    %0 = arith.cmpi eq, %arg0, %c0_i32 : i32
    %1 = arith.extui %0 : i1 to i32
    %c0_i32_0 = arith.constant 0 : i32
    %2 = arith.cmpi ne, %1, %c0_i32_0 : i32
    scf.if %2 {
      %cst_49 = arith.constant 0.000000e+00 : f32
      %72 = vector.broadcast %cst_49 : f32 to vector<2x128xf32>
      %c0_50 = arith.constant 0 : index
      %c0_51 = arith.constant 0 : index
      %73 = vector.load %arg6[%c0_50, %c0_51] : memref<2x128xf32, #tpu.memory_space<vmem>>, vector<2x128xf32>
      tpu.vector_store %arg6[%c0_50, %c0_51], %72 {strides = array<i32>} : memref<2x128xf32, #tpu.memory_space<vmem>>, vector<2x128xf32>,
      %cst_52 = arith.constant 1.000000e+00 : f32
      %74 = vector.broadcast %cst_52 : f32 to vector<2x1xf32>
      %c0_53 = arith.constant 0 : index
      %c64 = arith.constant 64 : index
      %75 = vector.load %arg6[%c0_53, %c64] : memref<2x128xf32, #tpu.memory_space<vmem>>, vector<2x1xf32>
      tpu.vector_store %arg6[%c0_53, %c64], %74 {strides = array<i32>} : memref<2x128xf32, #tpu.memory_space<vmem>>, vector<2x1xf32>,
      %c0_54 = arith.constant 0 : index
      %c0_55 = arith.constant 0 : index
      %c0_56 = arith.constant 0 : index
      %76 = vector.load %arg2[%c0_54, %c0_55, %c0_56] : memref<2x2x64xf32, #tpu.memory_space<vmem>>, vector<2x2x64xf32>
      %c0_57 = arith.constant 0 : index
      %c0_58 = arith.constant 0 : index
      %c0_59 = arith.constant 0 : index
      %77 = vector.load %arg5[%c0_57, %c0_58, %c0_59] : memref<2x2x64xf32, #tpu.memory_space<vmem>>, vector<2x2x64xf32>
      tpu.vector_store %arg5[%c0_57, %c0_58, %c0_59], %76 {strides = array<i32>} : memref<2x2x64xf32, #tpu.memory_space<vmem>>, vector<2x2x64xf32>,
    } else {
    }
    %c0 = arith.constant 0 : index
    %c0_1 = arith.constant 0 : index
    %c0_2 = arith.constant 0 : index
    %3 = vector.load %arg1[%c0, %c0_1, %c0_2] : memref<1x2x32xf32, #tpu.memory_space<vmem>>, vector<1x2x32xf32>
    %4 = vector.shape_cast %3 : vector<1x2x32xf32> to vector<2x32xf32>
    %c0_3 = arith.constant 0 : index
    %c0_4 = arith.constant 0 : index
    %5 = vector.load %arg6[%c0_3, %c0_4] : memref<2x128xf32, #tpu.memory_space<vmem>>, vector<2x32xf32>
    tpu.vector_store %arg6[%c0_3, %c0_4], %4 {strides = array<i32>} : memref<2x128xf32, #tpu.memory_space<vmem>>, vector<2x32xf32>,
    %c0_5 = arith.constant 0 : index
    %c0_6 = arith.constant 0 : index
    %c0_7 = arith.constant 0 : index
    %6 = vector.load %arg5[%c0_5, %c0_6, %c0_7] : memref<2x2x64xf32, #tpu.memory_space<vmem>>, vector<1x2x32xf32>
    %7 = vector.shape_cast %6 : vector<1x2x32xf32> to vector<2x32xf32>
    %c1 = arith.constant 1 : index
    %c0_8 = arith.constant 0 : index
    %c0_9 = arith.constant 0 : index
    %8 = vector.load %arg5[%c1, %c0_8, %c0_9] : memref<2x2x64xf32, #tpu.memory_space<vmem>>, vector<1x2x32xf32>
    %9 = vector.shape_cast %8 : vector<1x2x32xf32> to vector<2x32xf32>
    %c0_10 = arith.constant 0 : index
    %c32 = arith.constant 32 : index
    %10 = vector.load %arg6[%c0_10, %c32] : memref<2x128xf32, #tpu.memory_space<vmem>>, vector<2x32xf32>
    tpu.vector_store %arg6[%c0_10, %c32], %7 {strides = array<i32>} : memref<2x128xf32, #tpu.memory_space<vmem>>, vector<2x32xf32>,
    %c0_11 = arith.constant 0 : index
    %c0_12 = arith.constant 0 : index
    %11 = vector.load %arg6[%c0_11, %c0_12] : memref<2x128xf32, #tpu.memory_space<vmem>>, vector<2x128xf32>
    %12 = arith.truncf %11 : vector<2x128xf32> to vector<2x128xbf16>
    %c0_13 = arith.constant 0 : index
    %c0_14 = arith.constant 0 : index
    %c0_15 = arith.constant 0 : index
    %13 = vector.load %arg3[%c0_13, %c0_14, %c0_15] : memref<2x128x128xbf16, #tpu.memory_space<vmem>>, vector<1x128x128xbf16>
    %14 = vector.shape_cast %13 : vector<1x128x128xbf16> to vector<128x128xbf16>
    %cst = arith.constant dense<0.000000e+00> : vector<2x128xf32>
    %15 = tpu.matmul %12, %14, %cst {dimension_numbers = #tpu.dot_dimension_numbers<[1], [0], [0], [1], [0, 0, 1, 1], [], []>} : vector<2x128xbf16>, vector<128x128xbf16>, vector<2x128xf32> -> vector<2x128xf32>
    %16 = arith.negf %15 : vector<2x128xf32>
    %17 = math.exp %16 : vector<2x128xf32>
    %cst_16 = arith.constant 1.000000e+00 : f32
    %18 = vector.broadcast %cst_16 : f32 to vector<2x128xf32>
    %19 = arith.addf %18, %17 : vector<2x128xf32>
    %20 = arith.divf %18, %19 : vector<2x128xf32>
    %21 = math.tanh %15 : vector<2x128xf32>
    %22 = vector.extract_strided_slice %20 {offsets = [0, 0], sizes = [2, 32], strides = [1, 1]} : vector<2x128xf32> to vector<2x32xf32>
    %23 = vector.extract_strided_slice %20 {offsets = [0, 32], sizes = [2, 32], strides = [1, 1]} : vector<2x128xf32> to vector<2x32xf32>
    %24 = vector.extract_strided_slice %21 {offsets = [0, 64], sizes = [2, 32], strides = [1, 1]} : vector<2x128xf32> to vector<2x32xf32>
    %25 = vector.extract_strided_slice %20 {offsets = [0, 96], sizes = [2, 32], strides = [1, 1]} : vector<2x128xf32> to vector<2x32xf32>
    %26 = arith.mulf %23, %9 : vector<2x32xf32>
    %27 = arith.mulf %22, %24 : vector<2x32xf32>
    %28 = arith.addf %26, %27 : vector<2x32xf32>
    %29 = math.tanh %28 : vector<2x32xf32>
    %30 = arith.mulf %25, %29 : vector<2x32xf32>
    %c0_17 = arith.constant 0 : index
    %c0_18 = arith.constant 0 : index
    %c0_19 = arith.constant 0 : index
    %31 = vector.load %arg5[%c0_17, %c0_18, %c0_19] : memref<2x2x64xf32, #tpu.memory_space<vmem>>, vector<1x2x32xf32>
    %32 = vector.shape_cast %31 : vector<1x2x32xf32> to vector<2x32xf32>
    %33 = vector.shape_cast %30 : vector<2x32xf32> to vector<1x2x32xf32>
    tpu.vector_store %arg5[%c0_17, %c0_18, %c0_19], %33 {strides = array<i32>} : memref<2x2x64xf32, #tpu.memory_space<vmem>>, vector<1x2x32xf32>,
    %c1_20 = arith.constant 1 : index
    %c0_21 = arith.constant 0 : index
    %c0_22 = arith.constant 0 : index
    %34 = vector.load %arg5[%c1_20, %c0_21, %c0_22] : memref<2x2x64xf32, #tpu.memory_space<vmem>>, vector<1x2x32xf32>
    %35 = vector.shape_cast %34 : vector<1x2x32xf32> to vector<2x32xf32>
    %36 = vector.shape_cast %28 : vector<2x32xf32> to vector<1x2x32xf32>
    tpu.vector_store %arg5[%c1_20, %c0_21, %c0_22], %36 {strides = array<i32>} : memref<2x2x64xf32, #tpu.memory_space<vmem>>, vector<1x2x32xf32>,
    %c0_23 = arith.constant 0 : index
    %c0_24 = arith.constant 0 : index
    %37 = vector.load %arg6[%c0_23, %c0_24] : memref<2x128xf32, #tpu.memory_space<vmem>>, vector<2x32xf32>
    tpu.vector_store %arg6[%c0_23, %c0_24], %30 {strides = array<i32>} : memref<2x128xf32, #tpu.memory_space<vmem>>, vector<2x32xf32>,
    %c0_25 = arith.constant 0 : index
    %c0_26 = arith.constant 0 : index
    %c32_27 = arith.constant 32 : index
    %38 = vector.load %arg5[%c0_25, %c0_26, %c32_27] : memref<2x2x64xf32, #tpu.memory_space<vmem>>, vector<1x2x32xf32>
    %39 = vector.shape_cast %38 : vector<1x2x32xf32> to vector<2x32xf32>
    %c1_28 = arith.constant 1 : index
    %c0_29 = arith.constant 0 : index
    %c32_30 = arith.constant 32 : index
    %40 = vector.load %arg5[%c1_28, %c0_29, %c32_30] : memref<2x2x64xf32, #tpu.memory_space<vmem>>, vector<1x2x32xf32>
    %41 = vector.shape_cast %40 : vector<1x2x32xf32> to vector<2x32xf32>
    %c0_31 = arith.constant 0 : index
    %c32_32 = arith.constant 32 : index
    %42 = vector.load %arg6[%c0_31, %c32_32] : memref<2x128xf32, #tpu.memory_space<vmem>>, vector<2x32xf32>
    tpu.vector_store %arg6[%c0_31, %c32_32], %39 {strides = array<i32>} : memref<2x128xf32, #tpu.memory_space<vmem>>, vector<2x32xf32>,
    %c0_33 = arith.constant 0 : index
    %c0_34 = arith.constant 0 : index
    %43 = vector.load %arg6[%c0_33, %c0_34] : memref<2x128xf32, #tpu.memory_space<vmem>>, vector<2x128xf32>
    %44 = arith.truncf %43 : vector<2x128xf32> to vector<2x128xbf16>
    %c1_35 = arith.constant 1 : index
    %c0_36 = arith.constant 0 : index
    %c0_37 = arith.constant 0 : index
    %45 = vector.load %arg3[%c1_35, %c0_36, %c0_37] : memref<2x128x128xbf16, #tpu.memory_space<vmem>>, vector<1x128x128xbf16>
    %46 = vector.shape_cast %45 : vector<1x128x128xbf16> to vector<128x128xbf16>
    %cst_38 = arith.constant dense<0.000000e+00> : vector<2x128xf32>
    %47 = tpu.matmul %44, %46, %cst_38 {dimension_numbers = #tpu.dot_dimension_numbers<[1], [0], [0], [1], [0, 0, 1, 1], [], []>} : vector<2x128xbf16>, vector<128x128xbf16>, vector<2x128xf32> -> vector<2x128xf32>
    %48 = arith.negf %47 : vector<2x128xf32>
    %49 = math.exp %48 : vector<2x128xf32>
    %cst_39 = arith.constant 1.000000e+00 : f32
    %50 = vector.broadcast %cst_39 : f32 to vector<2x128xf32>
    %51 = arith.addf %50, %49 : vector<2x128xf32>
    %52 = arith.divf %50, %51 : vector<2x128xf32>
    %53 = math.tanh %47 : vector<2x128xf32>
    %54 = vector.extract_strided_slice %52 {offsets = [0, 0], sizes = [2, 32], strides = [1, 1]} : vector<2x128xf32> to vector<2x32xf32>
    %55 = vector.extract_strided_slice %52 {offsets = [0, 32], sizes = [2, 32], strides = [1, 1]} : vector<2x128xf32> to vector<2x32xf32>
    %56 = vector.extract_strided_slice %53 {offsets = [0, 64], sizes = [2, 32], strides = [1, 1]} : vector<2x128xf32> to vector<2x32xf32>
    %57 = vector.extract_strided_slice %52 {offsets = [0, 96], sizes = [2, 32], strides = [1, 1]} : vector<2x128xf32> to vector<2x32xf32>
    %58 = arith.mulf %55, %41 : vector<2x32xf32>
    %59 = arith.mulf %54, %56 : vector<2x32xf32>
    %60 = arith.addf %58, %59 : vector<2x32xf32>
    %61 = math.tanh %60 : vector<2x32xf32>
    %62 = arith.mulf %57, %61 : vector<2x32xf32>
    %c0_40 = arith.constant 0 : index
    %c0_41 = arith.constant 0 : index
    %c32_42 = arith.constant 32 : index
    %63 = vector.load %arg5[%c0_40, %c0_41, %c32_42] : memref<2x2x64xf32, #tpu.memory_space<vmem>>, vector<1x2x32xf32>
    %64 = vector.shape_cast %63 : vector<1x2x32xf32> to vector<2x32xf32>
    %65 = vector.shape_cast %62 : vector<2x32xf32> to vector<1x2x32xf32>
    tpu.vector_store %arg5[%c0_40, %c0_41, %c32_42], %65 {strides = array<i32>} : memref<2x2x64xf32, #tpu.memory_space<vmem>>, vector<1x2x32xf32>,
    %c1_43 = arith.constant 1 : index
    %c0_44 = arith.constant 0 : index
    %c32_45 = arith.constant 32 : index
    %66 = vector.load %arg5[%c1_43, %c0_44, %c32_45] : memref<2x2x64xf32, #tpu.memory_space<vmem>>, vector<1x2x32xf32>
    %67 = vector.shape_cast %66 : vector<1x2x32xf32> to vector<2x32xf32>
    %68 = vector.shape_cast %60 : vector<2x32xf32> to vector<1x2x32xf32>
    tpu.vector_store %arg5[%c1_43, %c0_44, %c32_45], %68 {strides = array<i32>} : memref<2x2x64xf32, #tpu.memory_space<vmem>>, vector<1x2x32xf32>,
    %c0_46 = arith.constant 0 : index
    %c0_47 = arith.constant 0 : index
    %c0_48 = arith.constant 0 : index
    %69 = vector.load %arg4[%c0_46, %c0_47, %c0_48] : memref<1x2x32xf32, #tpu.memory_space<vmem>>, vector<1x2x32xf32>
    %70 = vector.shape_cast %69 : vector<1x2x32xf32> to vector<2x32xf32>
    %71 = vector.shape_cast %62 : vector<2x32xf32> to vector<1x2x32xf32>
    tpu.vector_store %arg4[%c0_46, %c0_47, %c0_48], %71 {strides = array<i32>} : memref<1x2x32xf32, #tpu.memory_space<vmem>>, vector<1x2x32xf32>,
    return
  }
  func.func @transform_0(%arg0: i32) -> (i32, i32, i32) {
    %c0_i32 = arith.constant 0 : i32
    %c0_i32_0 = arith.constant 0 : i32
    %c0_i32_1 = arith.constant 0 : i32
    return %arg0, %c0_i32, %c0_i32_0 : i32, i32, i32
  }
  func.func @transform_1(%arg0: i32) -> (i32, i32, i32) {
    %c0_i32 = arith.constant 0 : i32
    %c0_i32_0 = arith.constant 0 : i32
    %c0_i32_1 = arith.constant 0 : i32
    %c0_i32_2 = arith.constant 0 : i32
    return %c0_i32, %c0_i32_0, %c0_i32_1 : i32, i32, i32
  }
  func.func @transform_2(%arg0: i32) -> (i32, i32, i32) {
    %c0_i32 = arith.constant 0 : i32
    %c0_i32_0 = arith.constant 0 : i32
    %c0_i32_1 = arith.constant 0 : i32
    %c0_i32_2 = arith.constant 0 : i32
    return %c0_i32, %c0_i32_0, %c0_i32_1 : i32, i32, i32
  }
  func.func @transform_3(%arg0: i32) -> (i32, i32, i32) {
    %c0_i32 = arith.constant 0 : i32
    %c0_i32_0 = arith.constant 0 : i32
    %c0_i32_1 = arith.constant 0 : i32
    return %arg0, %c0_i32, %c0_i32_0 : i32, i32, i32
  }
  func.func @transform_4(%arg0: i32) -> (i32, i32, i32) {
    %c0_i32 = arith.constant 0 : i32
    %c0_i32_0 = arith.constant 0 : i32
    %c0_i32_1 = arith.constant 0 : i32
    %c0_i32_2 = arith.constant 0 : i32
    return %c0_i32, %c0_i32_0, %c0_i32_1 : i32, i32, i32
  }
}

</mosaic_0001>

<bundles_post_ra>
// kernel: tpu_custom_call.1
= control target key start
LH: loop header
LB: loop body
LE: loop exit
PB: predicated region body
PF: predicated region fallthrough
CT: control target
= control target key end

     0   :  { %10 = vsyncpa [#allocation4], 0  ;;  %s752_s0 = inlined_call_operand.vmem [shape: f32[1,2,32], index: 0, kind: input, shape index: {}]   ;;  %s753_s1 = inlined_call_operand.hbm [shape: f32[2,2,64], index: 1, kind: input, shape index: {}, may-alias: {1,4}]   ;;  %s754_s2 = inlined_call_operand.hbm [shape: bf16[2,128,128], index: 2, kind: input, shape index: {}]   ;;  %s755_s3 = inlined_call_operand.hbm [shape: f32[1,2,32], index: 3, kind: output, shape index: {0}]   ;;  %s756_s4 = inlined_call_operand.hbm [shape: f32[2,2,64], index: 4, kind: output, shape index: {1}, may-alias: {1,4}]  }
   0x1   :  { %11 = vsyncpa [#allocation7], 0 }
   0x2   :  { %12 = vsyncpa [#allocation5], 0 }
   0x3   :  { %13 = vsyncpa [#allocation10], 0  ;;  %s608_s15 = smov [#allocation3]   ;;  %s512_s19 = scalar_lea.hbm %s753_s1, 64 }
   0x4   :  { %s21_s16 = sshll.u32 %s608_s15, 4  ;;  %p513_p0 = scmp.ne.s32.totalorder %s753_s1, %s512_s19  ;;  %s22_s16 = int_to_ptr.vmem [resolvable:$true] %s21_s16 }
   0x5   :  { %p516_p1 = scmp.lt.u32.totalorder %s512_s19, %s753_s1 }
   0x7   :  { %p518_p2 = pnand %p516_p1, %p513_p0 }
   0x9   :  { %521 = shalt.err (!%p518_p2)
}
   0xa   :  { %s522_s24 = scalar_lea.vmem %s22_s16, 64  ;;  %p527_p4 = scmp.lt.s32.totalorder %s22_s16, %s22_s16 }
   0xb   :  { %p523_p3 = scmp.ne.s32.totalorder %s22_s16, %s522_s24  ;;  %p528_p5 = scmp.lt.s32.totalorder %s522_s24, %s522_s24 }
   0xd   :  { %p529_p6 = por %p528_p5, %p527_p4 }
   0xf   :  { %p530_p7 = pnand %p529_p6, %p523_p3 }
  0x11   :  { %533 = shalt.err (!%p530_p7)
}
  0x12   :  { %s609_s25 = smov 32   ;;  %s610_s26 = smov 2  }
  0x13   :  { %27 = dma.hbm_to_vmem [thread:$0]  %s753_s1, 64, %s22_s16, [#allocation4], %s609_s25, %s609_s25, %s610_s26  }
  0x14   :  { %s611_s29 = smov [#allocation6]   ;;  %s534_s7 = scalar_lea.hbm %s754_s2, 2048 }
  0x15   :  { %s33_s30 = sshll.u32 %s611_s29, 4  ;;  %p535_p8 = scmp.ne.s32.totalorder %s754_s2, %s534_s7  ;;  %s34_s30 = int_to_ptr.vmem [resolvable:$true] %s33_s30 }
  0x16   :  { %p538_p9 = scmp.lt.u32.totalorder %s534_s7, %s754_s2 }
  0x18   :  { %p540_p10 = pnand %p538_p9, %p535_p8 }
  0x1a   :  { %543 = shalt.err (!%p540_p10)
}
  0x1b   :  { %s544_s12 = scalar_lea.vmem %s34_s30, 2048  ;;  %p549_p12 = scmp.lt.s32.totalorder %s34_s30, %s34_s30 }
  0x1c   :  { %p545_p11 = scmp.ne.s32.totalorder %s34_s30, %s544_s12  ;;  %p550_p13 = scmp.lt.s32.totalorder %s544_s12, %s544_s12 }
  0x1e   :  { %p551_p0 = por %p550_p13, %p549_p12 }
  0x20   :  { %p552_p1 = pnand %p551_p0, %p545_p11 }
  0x22   :  { %555 = shalt.err (!%p552_p1)
}
  0x23   :  { %s612_s1 = smov 64   ;;  %s613_s13 = smov 4  }
  0x24   :  { %39 = dma.hbm_to_vmem [thread:$0]  %s754_s2, 2048, %s34_s30, [#allocation7], %s612_s1, %s612_s1, %s613_s13  }
  0x25   :  { %600 = dma.done.wait [#allocation4], 64  }
  0x26   :  { %601 = vsyncadd [#allocation4], 4294967232 }
  0x27   :  { %602 = dma.done.wait [#allocation7], 2048  }
  0x28   :  { %603 = vsyncadd [#allocation7], 4294965248  ;;  %vm52_vm0 = vcmask 525824   ;;  %v614_v0 = vmov 0.0   ;;  %v615_v1 = vmov 1.0   ;;  %vm616_vm1 = vmmov 0  }
  0x29   :  { %428 = vmatprep.subr.bf16.mxu0 %v614_v0  ;;  %51 = vst [vmem:[#allocation2] sm:$0x3] %v614_v0  ;;  %448 = vmatprep.subr.bf16.mxu1 %v614_v0  ;;  %vm56_vm2 = vcmask 517120   ;;  %v54_v2 = vld [vmem:[#allocation3] sm:$0x3]  ;;  %v480_v3 = vld [vmem:[#allocation6] sm:$0xff]  }
  0x2a   :  { %53 = vst.msk [vmem:[#allocation2] sm:$0x3] %vm52_vm0, %v615_v1  ;;  %444 = vmatprep.mubr.msk.bf16.mxu0 %vm616_vm1, %v614_v0  ;;  %464 = vmatprep.mubr.msk.bf16.mxu1 %vm616_vm1, %v614_v0  ;;  %v481_v4 = vld [vmem:[#allocation6 + $0x8] sm:$0xff]   ;;  %vm60_vm3 = vcmask 254976   ;;  %v59_v5 = vld [vmem:[%s752_s0] sm:$0x3] }
  0x2b   :  { %57 = vst.msk [vmem:[#allocation9] sm:$0x3] %vm56_vm2, %v54_v2  ;;  %429 = vmatpush3.bf16.msra.mxu0 %v480_v3  ;;  %v482_v6 = vld [vmem:[#allocation6 + $0x10] sm:$0xff]   ;;  %v483_v8 = vld [vmem:[#allocation6 + $0x18] sm:$0xff]   ;;  %v484_v10 = vld [vmem:[#allocation6 + $0x20] sm:$0xff]   ;;  %vm69_vm4 = vcmask 517376  }
  0x2c   :  { %430 = vmatprep.subr.bf16.mxu0 %v614_v0  ;;  %61 = vst.msk [vmem:[#allocation2] sm:$0x3] %vm60_vm3, %v59_v5  ;;  %v55_v9 = vld [vmem:[#allocation3 + $0x2] sm:$0x3]  ;;  %v485_v12 = vld [vmem:[#allocation6 + $0x28] sm:$0xff]   ;;  %v486_v13 = vld [vmem:[#allocation6 + $0x30] sm:$0xff]  }
  0x2d   :  { %58 = vst.msk [vmem:[#allocation9 + $0x2] sm:$0x3] %vm56_vm2, %v55_v9  ;;  %v487_v14 = vld [vmem:[#allocation6 + $0x38] sm:$0xff]   ;;  %v488_v33 = vld [vmem:[#allocation6 + $0x40] sm:$0xff]   ;;  %v489_v34 = vld [vmem:[#allocation6 + $0x48] sm:$0xff]   ;;  %s617_s0 = smov 96  }
  0x2e   :  { %449 = vmatpush3.bf16.msra.mxu1 %v488_v33  ;;  %v490_v36 = vld [vmem:[#allocation6 + $0x50] sm:$0xff]   ;;  %v491_v37 = vld [vmem:[#allocation6 + $0x58] sm:$0xff]   ;;  %v492_v38 = vld [vmem:[#allocation6 + $0x60] sm:$0xff]   ;;  %s618_s17 = smov [#allocation8]   ;;  %s619_s19 = smov [#allocation9]  }
  0x2f   :  { %431 = vmatpush3.bf16.msra.mxu0 %v481_v4  ;;  %450 = vmatprep.subr.bf16.mxu1 %v614_v0  ;;  %v493_v39 = vld [vmem:[#allocation6 + $0x68] sm:$0xff]   ;;  %v494_v40 = vld [vmem:[#allocation6 + $0x70] sm:$0xff]   ;;  %v495_v43 = vld [vmem:[#allocation6 + $0x78] sm:$0xff]   ;;  %s366_s18 = sshll.u32 %s618_s17, 4  ;;  %s375_s20 = sshll.u32 %s619_s19, 4  ;;  %s367_s18 = int_to_ptr.vmem [resolvable:$true] %s366_s18  ;;  %s716_s20 = int_to_ptr.vmem [resolvable:$true] %s375_s20 }
  0x30   :  { %432 = vmatprep.subr.bf16.mxu0 %v614_v0  ;;  %s556_s21 = scalar_lea.vmem %s367_s18, 32  ;;  %p561_p3 = scmp.lt.s32.totalorder %s367_s18, %s367_s18 }
  0x31   :  { %p557_p2 = scmp.ne.s32.totalorder %s367_s18, %s556_s21  ;;  %p562_p4 = scmp.lt.s32.totalorder %s556_s21, %s556_s21 }
  0x32   :  { %v62_v7 = vld [vmem:[#allocation9] sm:$0x3]  ;;  %451 = vmatpush3.bf16.msra.mxu1 %v489_v34 }
  0x33   :  { %66 = vrot.lane.b32.xlu0 %v62_v7, %s609_s25  ;;  %433 = vmatpush3.bf16.msra.mxu0 %v482_v6  ;;  %p563_p5 = por %p562_p4, %p561_p3 }
  0x34   :  { %434 = vmatprep.subr.bf16.mxu0 %v614_v0  ;;  %v64_v11 = vld [vmem:[#allocation9 + $0x2] sm:$0x3]  ;;  %452 = vmatprep.subr.bf16.mxu1 %v614_v0 }
  0x35   :  { %185 = vrot.lane.b32.xlu1 %v64_v11, %s609_s25  ;;  %p564_p6 = pnand %p563_p5, %p557_p2 }
  0x36   :  { %453 = vmatpush3.bf16.msra.mxu1 %v490_v36 }
  0x37   :  { %435 = vmatpush3.bf16.msra.mxu0 %v483_v8  ;;  %454 = vmatprep.subr.bf16.mxu1 %v614_v0 }
  0x38   :  { %436 = vmatprep.subr.bf16.mxu0 %v614_v0 }
  0x3a   :  { %455 = vmatpush3.bf16.msra.mxu1 %v491_v37 }
  0x3b   :  { %437 = vmatpush3.bf16.msra.mxu0 %v484_v10  ;;  %456 = vmatprep.subr.bf16.mxu1 %v614_v0 }
  0x3c   :  { %438 = vmatprep.subr.bf16.mxu0 %v614_v0 }
  0x3e   :  { %457 = vmatpush3.bf16.msra.mxu1 %v492_v38 }
  0x3f   :  { %439 = vmatpush3.bf16.msra.mxu0 %v485_v12  ;;  %458 = vmatprep.subr.bf16.mxu1 %v614_v0 }
  0x40   :  { %440 = vmatprep.subr.bf16.mxu0 %v614_v0 }
  0x42   :  { %459 = vmatpush3.bf16.msra.mxu1 %v493_v39 }
  0x43   :  { %441 = vmatpush3.bf16.msra.mxu0 %v486_v13  ;;  %460 = vmatprep.subr.bf16.mxu1 %v614_v0 }
  0x44   :  { %442 = vmatprep.subr.bf16.mxu0 %v614_v0 }
  0x46   :  { %461 = vmatpush3.bf16.msra.mxu1 %v494_v40 }
  0x47   :  { %443 = vmatpush3.bf16.msra.mxu0 %v487_v14  ;;  %462 = vmatprep.subr.bf16.mxu1 %v614_v0 }
  0x4a   :  { %463 = vmatpush3.bf16.msra.mxu1 %v495_v43 }
  0xa5   :  { %v67_v15 = vpop.permute.xlu0 %66 }
  0xa6   :  { %70 = vst.msk [vmem:[#allocation2] sm:$0x3] %vm69_vm4, %v67_v15 }
  0xa7   :  { %v186_v29 = vpop.permute.xlu1 %185 }
  0xad   :  { %v71_v16 = vld [vmem:[#allocation2] sm:$0x3] }
  0xae   :  { %v72_v17 = vpack.c.bf16 %v71_v16, %v71_v16 }
  0xb0   :  { %445 = vmatmul.mubr.bf16.vlgmr.msra.gmra.mrb[0].mxu0 %v72_v17 }
 0x183   :  { %v171_v18 = vpop.f32.mrb[0].mxu0 }
 0x184   :  { %496 = vtanh.f32 %v171_v18  ;;  %v446_v19 = vpop.f32.mrb[1].mxu0  ;;  %v400_v23 = vmul.f32 -1.442695, %v171_v18 }
 0x185   :  { %v174_v20 = vpop.f32.mrb[2].mxu0 }
 0x186   :  { %v447_v21 = vpop.f32.mrb[3].mxu0  ;;  %498 = vpow2.f32 %v400_v23 }
 0x18e   :  { %v497_v22 = vpop.eup %496 }
 0x18f   :  { %190 = vrot.lane.b32.xlu0 %v497_v22, %s612_s1 }
 0x190   :  { %v499_v24 = vpop.eup %498 }
 0x191   :  { %v180_v25 = vadd.f32 1.0, %v499_v24 }
 0x193   :  { %500 = vrcp.f32 %v180_v25 }
 0x19d   :  { %v501_v26 = vpop.eup %500 }
 0x19e   :  { %v188_v30 = vmul.f32 %v501_v26, %v186_v29 }
 0x201   :  { %v191_v27 = vpop.permute.xlu0 %190 }
 0x202   :  { %v193_v28 = vmul.f32 %v501_v26, %v191_v27 }
 0x204   :  { %195 = vrot.lane.b32.xlu1 %v193_v28, %s609_s25 }
 0x276   :  { %v196_v31 = vpop.permute.xlu1 %195 }
 0x277   :  { %v198_v32 = vadd.f32 %v196_v31, %v188_v30 }
 0x279   :  { %502 = vtanh.f32 %v198_v32 }
 0x283   :  { %v503_v35 = vpop.eup %502 }
 0x284   :  { %201 = vrot.lane.b32.xlu0 %v503_v35, %s612_s1 }
 0x2f6   :  { %v202_v41 = vpop.permute.xlu0 %201 }
 0x2f7   :  { %v204_v42 = vmul.f32 %v501_v26, %v202_v41 }
 0x2f9   :  { %206 = vrot.lane.b32.xlu1 %v204_v42, %s609_s25 }
 0x2fd   :  { %211 = vrot.lane.b32.xlu1 %v198_v32, %s617_s0 }
 0x36b   :  { %v207_v44 = vpop.permute.xlu1 %206 }
 0x36c   :  { %209 = vst.msk [vmem:[#allocation9] sm:$0x3] %vm60_vm3, %v207_v44  ;;  %215 = vst.msk [vmem:[#allocation2] sm:$0x3] %vm60_vm3, %v207_v44 }
 0x36f   :  { %v212_v45 = vpop.permute.xlu1 %211 }
 0x370   :  { %214 = vst.msk [vmem:[#allocation9 + $0x2] sm:$0x3] %vm60_vm3, %v212_v45 }
 0x373   :  { %v216_v46 = vld [vmem:[#allocation9] sm:$0x3] }
 0x374   :  { %218 = vst.msk [vmem:[#allocation2] sm:$0x3] %vm69_vm4, %v216_v46 }
 0x377   :  { %v217_v60 = vld [vmem:[#allocation9 + $0x2] sm:$0x3] }
 0x37b   :  { %v219_v47 = vld [vmem:[#allocation2] sm:$0x3] }
 0x37c   :  { %v220_v48 = vpack.c.bf16 %v219_v47, %v219_v47 }
 0x37e   :  { %465 = vmatmul.mubr.bf16.vlgmr.msra.gmra.mrb[0].mxu1 %v220_v48 }
 0x451   :  { %v320_v49 = vpop.f32.mrb[0].mxu1 }
 0x452   :  { %504 = vtanh.f32 %v320_v49  ;;  %v466_v50 = vpop.f32.mrb[1].mxu1  ;;  %v409_v54 = vmul.f32 -1.442695, %v320_v49 }
 0x453   :  { %v323_v51 = vpop.f32.mrb[2].mxu1 }
 0x454   :  { %v467_v52 = vpop.f32.mrb[3].mxu1  ;;  %506 = vpow2.f32 %v409_v54 }
 0x45c   :  { %v505_v53 = vpop.eup %504 }
 0x45d   :  { %335 = vrot.lane.b32.xlu0 %v505_v53, %s612_s1 }
 0x45e   :  { %v507_v55 = vpop.eup %506 }
 0x45f   :  { %v329_v56 = vadd.f32 1.0, %v507_v55 }
 0x461   :  { %508 = vrcp.f32 %v329_v56 }
 0x46b   :  { %v509_v57 = vpop.eup %508 }
 0x46c   :  { %v333_v61 = vmul.f32 %v509_v57, %v217_v60 }
 0x4cf   :  { %v336_v58 = vpop.permute.xlu0 %335 }
 0x4d0   :  { %v338_v59 = vmul.f32 %v509_v57, %v336_v58 }
 0x4d2   :  { %340 = vrot.lane.b32.xlu0 %v338_v59, %s609_s25 }
 0x544   :  { %v341_v62 = vpop.permute.xlu0 %340 }
 0x545   :  { %v343_v63 = vadd.f32 %v341_v62, %v333_v61 }
 0x547   :  { %510 = vtanh.f32 %v343_v63  ;;  %355 = vst.msk [vmem:[#allocation9 + $0x2] sm:$0x3] %vm69_vm4, %v343_v63 }
 0x551   :  { %v511_v0 = vpop.eup %510 }
 0x552   :  { %346 = vrot.lane.b32.xlu1 %v511_v0, %s612_s1 }
 0x5c4   :  { %v347_v1 = vpop.permute.xlu1 %346 }
 0x5c5   :  { %v349_v2 = vmul.f32 %v509_v57, %v347_v1 }
 0x5c7   :  { %356 = vrot.lane.b32.xlu1 %v349_v2, %s609_s25  ;;  %351 = vrot.lane.b32.xlu0 %v349_v2, %s612_s1 }
 0x639   :  { %v357_v3 = vpop.permute.xlu1 %356  ;;  %v352_v4 = vpop.permute.xlu0 %351 }
 0x63a   :  { %359 = vst.msk [vmem:[#allocation8] sm:$0x3] %vm60_vm3, %v357_v3 }
 0x63b   :  { %354 = vst.msk [vmem:[#allocation9] sm:$0x3] %vm69_vm4, %v352_v4 }
 0x63c   :  { %567 = shalt.err (!%p564_p6)
}
 0x63d   :  { %s568_s24 = scalar_lea.hbm %s755_s3, 32 }
 0x63e   :  { %p569_p7 = scmp.ne.s32.totalorder %s755_s3, %s568_s24  ;;  %p572_p8 = scmp.lt.u32.totalorder %s568_s24, %s755_s3 }
 0x640   :  { %p574_p9 = pnand %p572_p8, %p569_p7 }
 0x642   :  { %577 = shalt.err (!%p574_p9)
}
 0x643   :  { %369 = dma.vmem_to_hbm [thread:$0]  %s367_s18, 32, %s755_s3, [#allocation5]  }
 0x644   :  { %s578_s7 = scalar_lea.vmem %s716_s20, 64  ;;  %p583_p11 = scmp.lt.s32.totalorder %s716_s20, %s716_s20 }
 0x645   :  { %p579_p10 = scmp.ne.s32.totalorder %s716_s20, %s578_s7  ;;  %p584_p12 = scmp.lt.s32.totalorder %s578_s7, %s578_s7 }
 0x647   :  { %p585_p13 = por %p584_p12, %p583_p11 }
 0x649   :  { %p586_p0 = pnand %p585_p13, %p579_p10 }
 0x64b   :  { %589 = shalt.err (!%p586_p0)
}
 0x64c   :  { %s590_s10 = scalar_lea.hbm %s756_s4, 64 }
 0x64d   :  { %p591_p1 = scmp.ne.s32.totalorder %s756_s4, %s590_s10  ;;  %p594_p2 = scmp.lt.u32.totalorder %s590_s10, %s756_s4 }
 0x64f   :  { %p596_p3 = pnand %p594_p2, %p591_p1 }
 0x651   :  { %599 = shalt.err (!%p596_p3)
}
 0x652   :  { %381 = dma.vmem_to_hbm [thread:$0]  %s716_s20, 64, %s756_s4, [#allocation10], %s609_s25, %s609_s25, %s610_s26  }
 0x653   :  { %604 = dma.done.wait [#allocation5], 32  }
 0x654   :  { %605 = vsyncadd [#allocation5], 4294967264 }
 0x655   :  { %606 = dma.done.wait [#allocation10], 64  }
 0x656   :  { %607 = vsyncadd [#allocation10], 4294967232 }
 0x657   :  { %388 = vsyncpa [#allocation4], 1 }
 0x658   :  { %389 = vsyncpa [#allocation7], 1 }
 0x659   :  { %390 = vsyncpa [#allocation5], 1 }
 0x65a   :  { %391 = vsyncpa [#allocation10], 1 }

</bundles_post_ra>
